<compile_context>
chip_gen: v7x
topology: tpu7x:2x2x1
jax: 0.10.0
libtpu: 0.0.40
codegen_flags: <defaults>
</compile_context>

<pallas_src>
import functools

import jax
import jax.numpy as jnp
import numpy as np
from jax.experimental import pallas as pl
from jax.experimental.pallas import tpu as pltpu


def _make_kernel(Nb, L, Cin, Q, SC, m_max, append):
    """Nb batch elems per grid step; SC = stride*Cout; Q = L + m_max."""

    def kernel(x_ref, w1t_ref, b1_ref, w2_ref, b2t_ref, out_ref):
        # ---- stage 1: 1x1 conv + ReLU over all Nb*L rows (one matmul) ----
        x = x_ref[...]                                             # (Nb*L, Cin)
        h = jnp.dot(x, w1t_ref[...], preferred_element_type=jnp.float32)
        h = jnp.maximum(h + b1_ref[...], 0.0)                      # (Nb*L, Cin)

        # ---- stage 2: all ConvTranspose taps in ONE lane-dense matmul ----
        #   p[row, k*Cout + co] = sum_ci h[row, ci] * w2[ci, co, k]
        p = jnp.dot(h, w2_ref[...], preferred_element_type=jnp.float32)  # (Nb*L, Kp*Cout)

        bias = b2t_ref[...]                                        # (1, SC), b2 tiled per phase

        # ---- stage 3: polyphase accumulation = m_max+1 statically shifted adds,
        #      built fully in registers, single store per batch element ----
        for b in range(Nb):                                        # static, small
            acc = None
            for m in range(m_max + 1):                             # static, tiny
                sl = p[b * L:(b + 1) * L, m * SC:(m + 1) * SC]     # (L, SC) contiguous slab
                pieces = []
                if m > 0:
                    pieces.append(jnp.zeros((m, SC), jnp.float32))
                pieces.append(sl)
                if m_max - m > 0:
                    pieces.append(jnp.zeros((m_max - m, SC), jnp.float32))
                slab = pieces[0] if len(pieces) == 1 else jnp.concatenate(pieces, axis=0)
                acc = slab if acc is None else acc + slab          # (Q, SC)
            acc = acc + bias                                       # broadcast once per tile
            if append:
                acc = jnp.maximum(acc, 0.0)
            out_ref[b, :, :] = acc.astype(out_ref.dtype)           # write-once store

    return kernel


@functools.partial(jax.jit, static_argnames=("kernel_size", "stride", "append"))
def decoder_block_forward(x_ncl, w1, b1, w2, b2, *, kernel_size, stride, append):
    """x_ncl: (N, Cin, L) float32 (PyTorch NCL).  Returns (N, Cout, L_out)."""
    N, Cin, L = x_ncl.shape
    K = kernel_size
    Cout = w2.shape[1]
    L_out = (L - 1) * stride + K
    m_max = -(-K // stride) - 1            # ceil(K/stride) - 1
    Kp = (m_max + 1) * stride              # padded tap count -> contiguous slabs
    Q = L + m_max                          # per-phase rows emitted
    SC = stride * Cout                     # lane width of the output slab

    # ---- batch blocking: fold Nb batch elements into one matmul per step ----
    Nb = max(1, min(N, max(1, 256 // max(L, 1))))
    if Nb < N and (Nb * L) % 8 != 0:       # keep BlockSpec sublane-legal
        Nb = N
    N_pad = ((N + Nb - 1) // Nb) * Nb
    Gb = N_pad // Nb

    # ---- layout glue (one transpose in, one out; everything else is reshape) ----
    x_nlc = jnp.transpose(x_ncl, (0, 2, 1))                 # (N, L, Cin)
    if N_pad != N:
        x_nlc = jnp.pad(x_nlc, ((0, N_pad - N), (0, 0), (0, 0)))
    x2d = x_nlc.reshape(N_pad * L, Cin)                     # rows = batch*length

    w1_t = jnp.transpose(w1[:, :, 0], (1, 0))               # (Cin, Cin): x @ W1^T
    b1_2d = b1.reshape(1, Cin)
    # (Cin, Cout, K) -> (Cin, K, Cout) -> (Cin, K*Cout), zero-pad taps to Kp
    w2_all = jnp.transpose(w2, (0, 2, 1)).reshape(Cin, K * Cout)
    if Kp != K:
        w2_all = jnp.pad(w2_all, ((0, 0), (0, (Kp - K) * Cout)))
    b2_t = jnp.tile(b2, stride).reshape(1, SC)              # bias per phase (r*Cout+co -> b2[co])

    kernel = _make_kernel(Nb, L, Cin, Q, SC, m_max, append)

    out = pl.pallas_call(
        kernel,
        out_shape=jax.ShapeDtypeStruct((N_pad, Q, SC), jnp.float32),
        grid_spec=pltpu.PrefetchScalarGridSpec(
            num_scalar_prefetch=0,
            grid=(Gb,),
            in_specs=[
                pl.BlockSpec((Nb * L, Cin), lambda i: (i, 0)),
                pl.BlockSpec((Cin, Cin), lambda i: (0, 0)),
                pl.BlockSpec((1, Cin), lambda i: (0, 0)),
                pl.BlockSpec((Cin, Kp * Cout), lambda i: (0, 0)),
                pl.BlockSpec((1, SC), lambda i: (0, 0)),
            ],
            out_specs=pl.BlockSpec((Nb, Q, SC), lambda i: (i, 0, 0)),
        ),
        compiler_params=pltpu.CompilerParams(
            dimension_semantics=("parallel",)),
    )(x2d, w1_t, b1_2d, w2_all, b2_t)

    # free de-interleave: out[n, q, r*Cout+co] == y[n, q*stride+r, co]
    y_nlc = out.reshape(N_pad, Q * stride, Cout)[:N, :L_out, :]
    # TODO(synk): emitting NCL directly from the kernel would save this last HBM pass.
    return jnp.transpose(y_nlc, (0, 2, 1))                  # (N, Cout, L_out)


def reference_forward(x, w1, b1, w2, b2, kernel_size, stride, append):
    """Pure numpy reference matching PyTorch Conv1d / ConvTranspose1d semantics."""
    x = np.asarray(x); w1 = np.asarray(w1); b1 = np.asarray(b1)
    w2 = np.asarray(w2); b2 = np.asarray(b2)
    N, Cin, L = x.shape
    K = kernel_size
    Cout = w2.shape[1]
    h = np.einsum("oc,ncl->nol", w1[:, :, 0], x) + b1[None, :, None]
    h = np.maximum(h, 0.0)
    L_out = (L - 1) * stride + K
    y = np.zeros((N, Cout, L_out), np.float32)
    for l in range(L):
        for k in range(K):
            y[:, :, l * stride + k] += np.einsum("co,nc->no", w2[:, :, k], h[:, :, l])
    y += b2[None, :, None]
    if append:
        y = np.maximum(y, 0.0)
    return y


if __name__ == "__main__":
    # module hyper-params
    chin, chout, kernel_size, stride, append = 8, 4, 4, 2, True
    N, L = 2, 16

    key = jax.random.PRNGKey(0)
    k_x, k_w1, k_b1, k_w2, k_b2 = jax.random.split(key, 5)

    x = jax.random.normal(k_x, (N, chin, L), jnp.float32)
    # Conv1d(chin, chin, 1): weight (chin, chin, 1), bias (chin,)
    w1 = jax.random.normal(k_w1, (chin, chin, 1), jnp.float32) * 0.2
    b1 = jax.random.normal(k_b1, (chin,), jnp.float32) * 0.1
    # ConvTranspose1d(chin, chout, K, stride): weight (chin, chout, K), bias (chout,)
    w2 = jax.random.normal(k_w2, (chin, chout, kernel_size), jnp.float32) * 0.2
    b2 = jax.random.normal(k_b2, (chout,), jnp.float32) * 0.1

    y = decoder_block_forward(x, w1, b1, w2, b2,
                              kernel_size=kernel_size, stride=stride, append=append)
    y = jax.block_until_ready(y)

    y_ref = reference_forward(x, w1, b1, w2, b2, kernel_size, stride, append)
    assert y.shape == y_ref.shape, (y.shape, y_ref.shape)
    np.testing.assert_allclose(np.asarray(y), y_ref, rtol=1e-4, atol=1e-4)

    print("KERNEL_OK")
</pallas_src>

<mosaic_0001>
module attributes {stable_mosaic.version = 11 : i64} {
  func.func @kernel(%arg0: i32, %arg1: memref<32x8xf32, #tpu.memory_space<vmem>>, %arg2: memref<8x8xf32, #tpu.memory_space<vmem>>, %arg3: memref<1x8xf32, #tpu.memory_space<vmem>>, %arg4: memref<8x16xf32, #tpu.memory_space<vmem>>, %arg5: memref<1x8xf32, #tpu.memory_space<vmem>>, %arg6: memref<2x17x8xf32, #tpu.memory_space<vmem>>) attributes {dimension_semantics = [#tpu.dimension_semantics<parallel>], iteration_bounds = array<i64: 1>, scalar_prefetch = 0 : i64, scratch_operands = 0 : i64, tpu.core_type = #tpu.core_type<tc>, window_params = [{transform_indices = @transform_0, window_bounds = array<i64: 32, 8>}, {pipeline_mode = #tpu.pipeline_mode<synchronous>, transform_indices = @transform_1, window_bounds = array<i64: 8, 8>}, {pipeline_mode = #tpu.pipeline_mode<synchronous>, transform_indices = @transform_2, window_bounds = array<i64: 1, 8>}, {pipeline_mode = #tpu.pipeline_mode<synchronous>, transform_indices = @transform_3, window_bounds = array<i64: 8, 16>}, {pipeline_mode = #tpu.pipeline_mode<synchronous>, transform_indices = @transform_4, window_bounds = array<i64: 1, 8>}, {transform_indices = @transform_5, window_bounds = array<i64: 2, 17, 8>}]} {
    %c0 = arith.constant 0 : index
    %c0_0 = arith.constant 0 : index
    %0 = vector.load %arg1[%c0, %c0_0] : memref<32x8xf32, #tpu.memory_space<vmem>>, vector<32x8xf32>
    %c0_1 = arith.constant 0 : index
    %c0_2 = arith.constant 0 : index
    %1 = vector.load %arg2[%c0_1, %c0_2] : memref<8x8xf32, #tpu.memory_space<vmem>>, vector<8x8xf32>
    %cst = arith.constant dense<0.000000e+00> : vector<32x8xf32>
    %2 = tpu.matmul %0, %1, %cst {dimension_numbers = #tpu.dot_dimension_numbers<[1], [0], [0], [1], [0, 0, 1, 1], [], []>} : vector<32x8xf32>, vector<8x8xf32>, vector<32x8xf32> -> vector<32x8xf32>
    %c0_3 = arith.constant 0 : index
    %c0_4 = arith.constant 0 : index
    %3 = vector.load %arg3[%c0_3, %c0_4] : memref<1x8xf32, #tpu.memory_space<vmem>>, vector<1x8xf32>
    %4 = vector.broadcast %3 : vector<1x8xf32> to vector<32x8xf32>
    %5 = arith.addf %2, %4 : vector<32x8xf32>
    %cst_5 = arith.constant 0.000000e+00 : f32
    %6 = vector.broadcast %cst_5 : f32 to vector<32x8xf32>
    %7 = arith.maximumf %5, %6 : vector<32x8xf32>
    %c0_6 = arith.constant 0 : index
    %c0_7 = arith.constant 0 : index
    %8 = vector.load %arg4[%c0_6, %c0_7] : memref<8x16xf32, #tpu.memory_space<vmem>>, vector<8x16xf32>
    %cst_8 = arith.constant dense<0.000000e+00> : vector<32x16xf32>
    %9 = tpu.matmul %7, %8, %cst_8 {dimension_numbers = #tpu.dot_dimension_numbers<[1], [0], [0], [1], [0, 0, 1, 1], [], []>} : vector<32x8xf32>, vector<8x16xf32>, vector<32x16xf32> -> vector<32x16xf32>
    %c0_9 = arith.constant 0 : index
    %c0_10 = arith.constant 0 : index
    %10 = vector.load %arg5[%c0_9, %c0_10] : memref<1x8xf32, #tpu.memory_space<vmem>>, vector<1x8xf32>
    %11 = vector.extract_strided_slice %9 {offsets = [0, 0], sizes = [16, 8], strides = [1, 1]} : vector<32x16xf32> to vector<16x8xf32>
    %cst_11 = arith.constant 0.000000e+00 : f32
    %12 = vector.broadcast %cst_11 : f32 to vector<1x8xf32>
    %13 = tpu.concatenate %11, %12 in 0 : vector<16x8xf32>, vector<1x8xf32> -> vector<17x8xf32>
    %14 = vector.extract_strided_slice %9 {offsets = [0, 8], sizes = [16, 8], strides = [1, 1]} : vector<32x16xf32> to vector<16x8xf32>
    %cst_12 = arith.constant 0.000000e+00 : f32
    %15 = vector.broadcast %cst_12 : f32 to vector<1x8xf32>
    %16 = tpu.concatenate %15, %14 in 0 : vector<1x8xf32>, vector<16x8xf32> -> vector<17x8xf32>
    %17 = arith.addf %13, %16 : vector<17x8xf32>
    %18 = vector.broadcast %10 : vector<1x8xf32> to vector<17x8xf32>
    %19 = arith.addf %17, %18 : vector<17x8xf32>
    %cst_13 = arith.constant 0.000000e+00 : f32
    %20 = vector.broadcast %cst_13 : f32 to vector<17x8xf32>
    %21 = arith.maximumf %19, %20 : vector<17x8xf32>
    %c0_14 = arith.constant 0 : index
    %c0_15 = arith.constant 0 : index
    %c0_16 = arith.constant 0 : index
    %22 = vector.load %arg6[%c0_14, %c0_15, %c0_16] : memref<2x17x8xf32, #tpu.memory_space<vmem>>, vector<1x17x8xf32>
    %23 = vector.shape_cast %22 : vector<1x17x8xf32> to vector<17x8xf32>
    %24 = vector.shape_cast %21 : vector<17x8xf32> to vector<1x17x8xf32>
    tpu.vector_store %arg6[%c0_14, %c0_15, %c0_16], %24 {strides = array<i32>} : memref<2x17x8xf32, #tpu.memory_space<vmem>>, vector<1x17x8xf32>,
    %25 = vector.extract_strided_slice %9 {offsets = [16, 0], sizes = [16, 8], strides = [1, 1]} : vector<32x16xf32> to vector<16x8xf32>
    %cst_17 = arith.constant 0.000000e+00 : f32
    %26 = vector.broadcast %cst_17 : f32 to vector<1x8xf32>
    %27 = tpu.concatenate %25, %26 in 0 : vector<16x8xf32>, vector<1x8xf32> -> vector<17x8xf32>
    %28 = vector.extract_strided_slice %9 {offsets = [16, 8], sizes = [16, 8], strides = [1, 1]} : vector<32x16xf32> to vector<16x8xf32>
    %cst_18 = arith.constant 0.000000e+00 : f32
    %29 = vector.broadcast %cst_18 : f32 to vector<1x8xf32>
    %30 = tpu.concatenate %29, %28 in 0 : vector<1x8xf32>, vector<16x8xf32> -> vector<17x8xf32>
    %31 = arith.addf %27, %30 : vector<17x8xf32>
    %32 = vector.broadcast %10 : vector<1x8xf32> to vector<17x8xf32>
    %33 = arith.addf %31, %32 : vector<17x8xf32>
    %cst_19 = arith.constant 0.000000e+00 : f32
    %34 = vector.broadcast %cst_19 : f32 to vector<17x8xf32>
    %35 = arith.maximumf %33, %34 : vector<17x8xf32>
    %c1 = arith.constant 1 : index
    %c0_20 = arith.constant 0 : index
    %c0_21 = arith.constant 0 : index
    %36 = vector.load %arg6[%c1, %c0_20, %c0_21] : memref<2x17x8xf32, #tpu.memory_space<vmem>>, vector<1x17x8xf32>
    %37 = vector.shape_cast %36 : vector<1x17x8xf32> to vector<17x8xf32>
    %38 = vector.shape_cast %35 : vector<17x8xf32> to vector<1x17x8xf32>
    tpu.vector_store %arg6[%c1, %c0_20, %c0_21], %38 {strides = array<i32>} : memref<2x17x8xf32, #tpu.memory_space<vmem>>, vector<1x17x8xf32>,
    return
  }
  func.func @transform_0(%arg0: i32) -> (i32, i32) {
    %c0_i32 = arith.constant 0 : i32
    %c0_i32_0 = arith.constant 0 : i32
    return %arg0, %c0_i32 : i32, i32
  }
  func.func @transform_1(%arg0: i32) -> (i32, i32) {
    %c0_i32 = arith.constant 0 : i32
    %c0_i32_0 = arith.constant 0 : i32
    %c0_i32_1 = arith.constant 0 : i32
    return %c0_i32, %c0_i32_0 : i32, i32
  }
  func.func @transform_2(%arg0: i32) -> (i32, i32) {
    %c0_i32 = arith.constant 0 : i32
    %c0_i32_0 = arith.constant 0 : i32
    %c0_i32_1 = arith.constant 0 : i32
    return %c0_i32, %c0_i32_0 : i32, i32
  }
  func.func @transform_3(%arg0: i32) -> (i32, i32) {
    %c0_i32 = arith.constant 0 : i32
    %c0_i32_0 = arith.constant 0 : i32
    %c0_i32_1 = arith.constant 0 : i32
    return %c0_i32, %c0_i32_0 : i32, i32
  }
  func.func @transform_4(%arg0: i32) -> (i32, i32) {
    %c0_i32 = arith.constant 0 : i32
    %c0_i32_0 = arith.constant 0 : i32
    %c0_i32_1 = arith.constant 0 : i32
    return %c0_i32, %c0_i32_0 : i32, i32
  }
  func.func @transform_5(%arg0: i32) -> (i32, i32, i32) {
    %c0_i32 = arith.constant 0 : i32
    %c0_i32_0 = arith.constant 0 : i32
    %c0_i32_1 = arith.constant 0 : i32
    return %arg0, %c0_i32, %c0_i32_0 : i32, i32, i32
  }
}

</mosaic_0001>

<bundles_post_ra>
// kernel: tile.8
= control target key start
LH: loop header
LB: loop body
LE: loop exit
PB: predicated region body
PF: predicated region fallthrough
CT: control target
= control target key end

     0   :  { %s22_s0 = inlined_call_operand.vmem [shape: f32[4], index: 0, kind: input, shape index: {}]   ;;  %s23_s1 = inlined_call_operand.vmem [shape: f32[2,4], index: 1, kind: output, shape index: {}]  }
   0x1   :  { %v4_v0 = vld [vmem:[%s22_s0] ss:$0 sm:$0xff] }
   0x2   :  { %5 = vst [vmem:[%s23_s1] sm:$0x3] %v4_v0 }

// kernel: tile.9
= control target key start
LH: loop header
LB: loop body
LE: loop exit
PB: predicated region body
PF: predicated region fallthrough
CT: control target
= control target key end

     0   :  { %vm7_vm0 = vcmask 31744   ;;  %vm13_vm1 = vcmask 64544   ;;  %s39_s0 = inlined_call_operand.vmem [shape: f32[2,4], index: 0, kind: input, shape index: {}]   ;;  %s40_s1 = inlined_call_operand.vmem [shape: f32[1,8], index: 1, kind: output, shape index: {}]  }
   0x1   :  { %v4_v0 = vld [vmem:[%s39_s0] sm:$0x3]  ;;  %s22_s0 = smov 4  }
   0x2   :  { %5 = vst [vmem:[#allocation1] sm:$0x3] %v4_v0 }
   0x9   :  { %v10_v1 = vld [vmem:[#allocation1 + $0x1] sm:$0x1]   ;;  %v6_v2 = vld [vmem:[#allocation1] sm:$0x1]  }
   0xa   :  { %11 = vrot.lane.b32.xlu0 %v10_v1, %s22_s0  ;;  %8 = vst.msk [vmem:[#allocation0] sm:$0x1] %vm7_vm0, %v6_v2  }
  0x7c   :  { %v12_v3 = vpop.permute.xlu0 %11  }
  0x7d   :  { %14 = vst.msk [vmem:[#allocation0] sm:$0x1] %vm13_vm1, %v12_v3  }
  0x84   :  { %v18_v4 = vld [vmem:[#allocation0] sm:$0x1] }
  0x85   :  { %20 = vst [vmem:[%s40_s1] sm:$0x1] %v18_v4 }

// kernel: decoder_block_forward.1
= control target key start
LH: loop header
LB: loop body
LE: loop exit
PB: predicated region body
PF: predicated region fallthrough
CT: control target
= control target key end

     0   :  { %vm32_vm0 = vcmask 64512   ;;  %vm235_vm1 = vcmask 1040384   ;;  %vm266_vm2 = vcmask 57344   ;;  %s429_s1 = inlined_call_operand.vmem [shape: f32[8,8], index: 1, kind: input, shape index: {}]   ;;  %s430_s0 = inlined_call_operand.vmem [shape: f32[32,8], index: 0, kind: input, shape index: {}]   ;;  %s431_s3 = inlined_call_operand.vmem [shape: f32[8,16], index: 3, kind: input, shape index: {}]   ;;  %s432_s2 = inlined_call_operand.vmem [shape: f32[1,8], index: 2, kind: input, shape index: {}]   ;;  %s433_s4 = inlined_call_operand.vmem [shape: f32[1,8], index: 4, kind: input, shape index: {}]   ;;  %s434_s5 = inlined_call_operand.vmem [shape: f32[2,17,8], index: 5, kind: output, shape index: {}]  }
   0x1   :  { %v24_v0 = vld [vmem:[%s429_s1] sm:$0xff]  ;;  %v21_v2 = vld [vmem:[%s430_s0 + $0x8] sm:$0xff]  ;;  %v22_v3 = vld [vmem:[%s430_s0 + $0x10] sm:$0xff] }
   0x2   :  { %v20_v1 = vld [vmem:[%s430_s0] sm:$0xff]  ;;  %323 = vmatprep.subr.mxu0 %v24_v0  ;;  %v23_v4 = vld [vmem:[%s430_s0 + $0x18] sm:$0xff]  ;;  %s340_s0 = smov 120  }
   0x3   :  { %325 = vmatprep.mubr.msk.f32.mxu0 %vm32_vm0, %v20_v1  ;;  %324 = vmatpush3.msra.mxu0 %v24_v0  ;;  %v134_v5 = vld [vmem:[%s431_s3] sm:$0xff] }
   0x4   :  { %326 = vmatmul.mubr.msk.f32.vlgmr.msra.gmra.mrb[0].mxu0 %vm32_vm0, %v21_v2  ;;  %331 = vmatprep.subr.mxu1 %v134_v5  ;;  %v300_v6 = vld [vmem:[%s432_s2] ss:$0 sm:$0xff] }
   0x5   :  { %328 = vmatprep.mubr.msk.f32.mxu0 %vm32_vm0, %v22_v3  ;;  %332 = vmatpush3.msra.mxu1 %v134_v5  ;;  %v309_v30 = vld [vmem:[%s433_s4] ss:$0 sm:$0xff] }
   0x8   :  { %329 = vmatmul.mubr.msk.f32.gmra.mrb[2].mxu0 %vm32_vm0, %v23_v4 }
  0xd7   :  { %v327_v7 = vpop.f32.mrb[0].mxu0 }
  0xd8   :  { %v117_v8 = vadd.f32 %v327_v7, %v300_v6  ;;  %v111_v9 = vpop.f32.mrb[1].mxu0 }
  0xd9   :  { %v112_v10 = vadd.f32 %v300_v6, %v111_v9 }
  0xda   :  { %v131_v13 = vmax.f32 %v117_v8, 0.0 }
  0xdb   :  { %v130_v11 = vmax.f32 %v112_v10, 0.0  ;;  %v330_v12 = vpop.f32.mrb[2].mxu0 }
  0xdc   :  { %v127_v14 = vadd.f32 %v330_v12, %v300_v6  ;;  %v121_v15 = vpop.f32.mrb[3].mxu0 }
  0xdd   :  { %v122_v16 = vadd.f32 %v300_v6, %v121_v15  ;;  %333 = vmatprep.mubr.msk.f32.mxu1 %vm32_vm0, %v130_v11 }
  0xde   :  { %334 = vmatmul.mubr.msk.f32.vlgmr.msra.gmra.mrb[0].mxu1 %vm32_vm0, %v131_v13  ;;  %v133_v18 = vmax.f32 %v127_v14, 0.0 }
  0xdf   :  { %v132_v17 = vmax.f32 %v122_v16, 0.0 }
  0xe1   :  { %336 = vmatprep.mubr.msk.f32.mxu1 %vm32_vm0, %v132_v17 }
  0xe2   :  { %337 = vmatmul.mubr.msk.f32.gmra.mrb[2].mxu1 %vm32_vm0, %v133_v18 }
 0x1b1   :  { %v335_v19 = vpop.f32.mrb[0].mxu1 }
 0x1b2   :  { %v237_v20 = vrot.slane %v335_v19, 7  ;;  %v213_v21 = vpop.f32.mrb[1].mxu1 }
 0x1b3   :  { %v236_v22 = vrot.slane %v213_v21, 7 }
 0x1b5   :  { %239 = vrot.lane.b32.xlu0 %v236_v22, %s340_s0  ;;  %v338_v23 = vpop.f32.mrb[2].mxu1  ;;  %v238_v24 = vsel %vm235_vm1, %v236_v22, %v237_v20 }
 0x1b6   :  { %v271_v25 = vrot.slane %v338_v23, 7  ;;  %241 = vrot.lane.b32.xlu1 %v238_v24, %s340_s0  ;;  %v223_v26 = vpop.f32.mrb[3].mxu1 }
 0x1b7   :  { %v270_v27 = vrot.slane %v223_v26, 7 }
 0x1b9   :  { %273 = vrot.lane.b32.xlu0 %v270_v27, %s340_s0  ;;  %v272_v28 = vsel %vm235_vm1, %v270_v27, %v271_v25 }
 0x1ba   :  { %275 = vrot.lane.b32.xlu1 %v272_v28, %s340_s0 }
 0x1bd   :  { %243 = vrot.lane.b32.xlu0 %v237_v20, %s340_s0 }
 0x1be   :  { %277 = vrot.lane.b32.xlu1 %v271_v25, %s340_s0 }
 0x227   :  { %v240_v29 = vpop.permute.xlu0 %239 }
 0x228   :  { %v248_v31 = vsel %vm235_vm1, 0.0, %v240_v29  ;;  %v242_v32 = vpop.permute.xlu1 %241 }
 0x229   :  { %v249_v33 = vadd.f32 %v248_v31, %v213_v21  ;;  %v250_v34 = vadd.f32 %v335_v19, %v242_v32 }
 0x22b   :  { %v258_v35 = vadd.f32 %v309_v30, %v249_v33  ;;  %v259_v36 = vadd.f32 %v309_v30, %v250_v34  ;;  %v274_v37 = vpop.permute.xlu0 %273 }
 0x22c   :  { %v282_v38 = vsel %vm235_vm1, 0.0, %v274_v37  ;;  %v276_v39 = vpop.permute.xlu1 %275 }
 0x22d   :  { %v261_v40 = vmax.f32 %v258_v35, 0.0  ;;  %v262_v41 = vmax.f32 %v259_v36, 0.0  ;;  %v283_v42 = vadd.f32 %v282_v38, %v223_v26  ;;  %v284_v43 = vadd.f32 %v338_v23, %v276_v39 }
 0x22f   :  { %264 = vst.msk [vmem:[%s434_s5] sm:$0xff] %vm32_vm0, %v261_v40  ;;  %265 = vst.msk [vmem:[%s434_s5 + $0x8] sm:$0xff] %vm32_vm0, %v262_v41  ;;  %v286_v44 = vadd.f32 %v309_v30, %v283_v42  ;;  %v287_v45 = vadd.f32 %v309_v30, %v284_v43  ;;  %v244_v46 = vpop.permute.xlu0 %243 }
 0x230   :  { %v260_v47 = vadd.f32 %v309_v30, %v244_v46  ;;  %v278_v48 = vpop.permute.xlu1 %277 }
 0x231   :  { %v289_v49 = vmax.f32 %v286_v44, 0.0  ;;  %v290_v50 = vmax.f32 %v287_v45, 0.0  ;;  %v288_v51 = vadd.f32 %v309_v30, %v278_v48 }
 0x232   :  { %v263_v52 = vmax.f32 %v260_v47, 0.0 }
 0x233   :  { %310 = vst.msk [vmem:[%s434_s5 + $0x18] sm:$0xff] %vm32_vm0, %v289_v49  ;;  %311 = vst.msk [vmem:[%s434_s5 + $0x20] sm:$0xff] %vm32_vm0, %v290_v50  ;;  %v291_v53 = vmax.f32 %v288_v51, 0.0 }
 0x234   :  { %267 = vst.msk [vmem:[%s434_s5 + $0x10] sm:$0x1] %vm266_vm2, %v263_v52 }
 0x235   :  { %312 = vst.msk [vmem:[%s434_s5 + $0x28] sm:$0x1] %vm266_vm2, %v291_v53 }

</bundles_post_ra>
